<compile_context>
chip_gen: v6e
topology: v6e:2x2x1
jax: 0.10.0
libtpu: 0.0.40
codegen_flags: <defaults>
</compile_context>

<pallas_src>
import jax
import jax.numpy as jnp
from jax import lax
from jax.experimental import pallas as pl
from jax.experimental.pallas import tpu as pltpu

EPS = 1e-5
LANE = 128


def nonlinear_kernel(x_ref, wt_ref, b_ref, gamma_ref, beta_ref, o_ref):
    # x_ref : (N, Cin)           matmul dtype (f32 or bf16)
    # wt_ref: (Cin, Cout_tile)   matmul dtype (pre-transposed weight tile)
    # b/gamma/beta: (1, Cout_tile) f32
    x = x_ref[...]
    wt = wt_ref[...]

    # Linear: y = x @ W_t + b   (MXU, f32 accumulation)
    y = jnp.dot(x, wt, preferred_element_type=jnp.float32) + b_ref[...]

    # ReLU
    y = jnp.maximum(y, 0.0)

    # BatchNorm1d (training-mode forward): stats over the batch axis,
    # biased variance, all in f32.
    n = y.shape[0]
    inv_n = 1.0 / n
    mean = jnp.sum(y, axis=0, keepdims=True) * inv_n          # (1, Cout_tile)
    diff = y - mean
    var = jnp.sum(diff * diff, axis=0, keepdims=True) * inv_n  # (1, Cout_tile)
    y_hat = diff * lax.rsqrt(var + EPS)

    o_ref[...] = (y_hat * gamma_ref[...] + beta_ref[...]).astype(o_ref.dtype)


def nonlinear_forward(x, w, b, gamma, beta, *,
                      cout_tile=LANE,
                      use_bf16_matmul=False,
                      out_dtype=jnp.float32,
                      vmem_limit_bytes=None):
    """Fused Linear -> ReLU -> BatchNorm1d (training-mode) forward.

    x:     (N, Cin)       w: (Cout, Cin)   (PyTorch nn.Linear layout)
    b, gamma, beta: (Cout,)
    """
    N, Cin = x.shape
    Cout = w.shape[0]
    assert cout_tile % LANE == 0, "Cout tile must be a multiple of 128 lanes"

    # Pre-transpose the weight once on the XLA/HBM side: (Cout, Cin) -> (Cin, Cout).
    wt = w.T

    # Pad Cout to a lane-dense multiple of the tile so stores are full vregs.
    cout_p = ((Cout + cout_tile - 1) // cout_tile) * cout_tile
    pad = cout_p - Cout
    if pad:
        wt = jnp.pad(wt, ((0, 0), (0, pad)))       # zero weight cols -> y=0 there
        b = jnp.pad(b, (0, pad))
        gamma = jnp.pad(gamma, (0, pad))
        beta = jnp.pad(beta, (0, pad))

    # Optional bf16 MXU operands (accumulation stays f32 inside the kernel).
    mm_dtype = jnp.bfloat16 if use_bf16_matmul else x.dtype
    x_mm = x.astype(mm_dtype)
    wt_mm = wt.astype(mm_dtype)

    b2 = b.reshape(1, cout_p).astype(jnp.float32)
    g2 = gamma.reshape(1, cout_p).astype(jnp.float32)
    bt2 = beta.reshape(1, cout_p).astype(jnp.float32)

    n_tiles = cout_p // cout_tile

    grid_spec = pltpu.PrefetchScalarGridSpec(
        num_scalar_prefetch=0,
        grid=(n_tiles,),
        in_specs=[
            # Full batch / full Cin per tile (BN stats need the whole batch).
            pl.BlockSpec((N, Cin), lambda j: (0, 0)),
            # Weight tiled along Cout only; Cin stays whole.
            pl.BlockSpec((Cin, cout_tile), lambda j: (0, j)),
            pl.BlockSpec((1, cout_tile), lambda j: (0, j)),
            pl.BlockSpec((1, cout_tile), lambda j: (0, j)),
            pl.BlockSpec((1, cout_tile), lambda j: (0, j)),
        ],
        out_specs=pl.BlockSpec((N, cout_tile), lambda j: (0, j)),
    )

    out_p = pl.pallas_call(
        nonlinear_kernel,
        out_shape=jax.ShapeDtypeStruct((N, cout_p), out_dtype),
        grid_spec=grid_spec,
        compiler_params=pltpu.CompilerParams(
            dimension_semantics=("parallel",),
            vmem_limit_bytes=vmem_limit_bytes,
        ),
    )(x_mm, wt_mm, b2, g2, bt2)

    return out_p[:, :Cout]


def nonlinear_reference(x, w, b, gamma, beta):
    y = x @ w.T + b[None, :]
    y = jnp.maximum(y, 0.0)
    mean = jnp.mean(y, axis=0, keepdims=True)
    var = jnp.mean((y - mean) ** 2, axis=0, keepdims=True)
    y = (y - mean) / jnp.sqrt(var + EPS)
    return y * gamma[None, :] + beta[None, :]


if __name__ == "__main__":
    # Small shapes: batch=8, input_channels=32, output_channels=64
    N, Cin, Cout = 8, 32, 64

    key = jax.random.PRNGKey(0)
    kx, kw, kb = jax.random.split(key, 3)

    x = jax.random.normal(kx, (N, Cin), dtype=jnp.float32)

    # Deterministic parameter init (PyTorch-Linear-like uniform bound).
    bound = 1.0 / (Cin ** 0.5)
    w = jax.random.uniform(kw, (Cout, Cin), jnp.float32, -bound, bound)
    b = jax.random.uniform(kb, (Cout,), jnp.float32, -bound, bound)
    gamma = jnp.ones((Cout,), jnp.float32)   # BatchNorm1d weight init
    beta = jnp.zeros((Cout,), jnp.float32)   # BatchNorm1d bias init

    ref = nonlinear_reference(x, w, b, gamma, beta)

    # f32 MXU path: must match the reference tightly.
    out = nonlinear_forward(x, w, b, gamma, beta)
    out = jax.block_until_ready(out)
    assert out.shape == (N, Cout)
    assert jnp.allclose(out, ref, atol=1e-4, rtol=1e-4), "f32 path mismatch vs reference"

    # bf16 MXU operands (f32 accumulation + f32 BN math): looser tolerance.
    out_bf16 = nonlinear_forward(x, w, b, gamma, beta, use_bf16_matmul=True)
    out_bf16 = jax.block_until_ready(out_bf16)
    assert out_bf16.shape == (N, Cout)
    assert jnp.allclose(out_bf16, ref, atol=5e-2, rtol=5e-2), "bf16 path mismatch vs reference"

    print("KERNEL_OK")
</pallas_src>

<mosaic_0001>
module attributes {stable_mosaic.version = 11 : i64} {
  func.func @nonlinear_kernel(%arg0: i32, %arg1: memref<8x32xf32, #tpu.memory_space<vmem>>, %arg2: memref<32x128xf32, #tpu.memory_space<vmem>>, %arg3: memref<1x128xf32, #tpu.memory_space<vmem>>, %arg4: memref<1x128xf32, #tpu.memory_space<vmem>>, %arg5: memref<1x128xf32, #tpu.memory_space<vmem>>, %arg6: memref<8x128xf32, #tpu.memory_space<vmem>>) attributes {dimension_semantics = [#tpu.dimension_semantics<parallel>], iteration_bounds = array<i64: 1>, scalar_prefetch = 0 : i64, scratch_operands = 0 : i64, tpu.core_type = #tpu.core_type<tc>, window_params = [{pipeline_mode = #tpu.pipeline_mode<synchronous>, transform_indices = @transform_0, window_bounds = array<i64: 8, 32>}, {transform_indices = @transform_1, window_bounds = array<i64: 32, 128>}, {transform_indices = @transform_2, window_bounds = array<i64: 1, 128>}, {transform_indices = @transform_3, window_bounds = array<i64: 1, 128>}, {transform_indices = @transform_4, window_bounds = array<i64: 1, 128>}, {transform_indices = @transform_5, window_bounds = array<i64: 8, 128>}]} {
    %c0 = arith.constant 0 : index
    %c0_0 = arith.constant 0 : index
    %0 = vector.load %arg1[%c0, %c0_0] : memref<8x32xf32, #tpu.memory_space<vmem>>, vector<8x32xf32>
    %c0_1 = arith.constant 0 : index
    %c0_2 = arith.constant 0 : index
    %1 = vector.load %arg2[%c0_1, %c0_2] : memref<32x128xf32, #tpu.memory_space<vmem>>, vector<32x128xf32>
    %cst = arith.constant dense<0.000000e+00> : vector<8x128xf32>
    %2 = tpu.matmul %0, %1, %cst {dimension_numbers = #tpu.dot_dimension_numbers<[1], [0], [0], [1], [0, 0, 1, 1], [], []>} : vector<8x32xf32>, vector<32x128xf32>, vector<8x128xf32> -> vector<8x128xf32>
    %c0_3 = arith.constant 0 : index
    %c0_4 = arith.constant 0 : index
    %3 = vector.load %arg3[%c0_3, %c0_4] : memref<1x128xf32, #tpu.memory_space<vmem>>, vector<1x128xf32>
    %4 = vector.broadcast %3 : vector<1x128xf32> to vector<8x128xf32>
    %5 = arith.addf %2, %4 : vector<8x128xf32>
    %cst_5 = arith.constant 0.000000e+00 : f32
    %6 = vector.broadcast %cst_5 : f32 to vector<8x128xf32>
    %7 = arith.maximumf %5, %6 : vector<8x128xf32>
    %cst_6 = arith.constant dense<0.000000e+00> : vector<128xf32>
    %8 = vector.multi_reduction <add>, %7, %cst_6 [0] : vector<8x128xf32> to vector<128xf32>
    %9 = vector.shape_cast %8 : vector<128xf32> to vector<1x128xf32>
    %cst_7 = arith.constant 1.250000e-01 : f32
    %10 = vector.broadcast %cst_7 : f32 to vector<1x128xf32>
    %11 = arith.mulf %9, %10 : vector<1x128xf32>
    %12 = vector.broadcast %11 : vector<1x128xf32> to vector<8x128xf32>
    %13 = arith.subf %7, %12 : vector<8x128xf32>
    %14 = arith.mulf %13, %13 : vector<8x128xf32>
    %cst_8 = arith.constant dense<0.000000e+00> : vector<128xf32>
    %15 = vector.multi_reduction <add>, %14, %cst_8 [0] : vector<8x128xf32> to vector<128xf32>
    %16 = vector.shape_cast %15 : vector<128xf32> to vector<1x128xf32>
    %cst_9 = arith.constant 1.250000e-01 : f32
    %17 = vector.broadcast %cst_9 : f32 to vector<1x128xf32>
    %18 = arith.mulf %16, %17 : vector<1x128xf32>
    %cst_10 = arith.constant 9.99999974E-6 : f32
    %19 = vector.broadcast %cst_10 : f32 to vector<1x128xf32>
    %20 = arith.addf %18, %19 : vector<1x128xf32>
    %21 = math.rsqrt %20 : vector<1x128xf32>
    %22 = vector.broadcast %21 : vector<1x128xf32> to vector<8x128xf32>
    %23 = arith.mulf %13, %22 : vector<8x128xf32>
    %c0_11 = arith.constant 0 : index
    %c0_12 = arith.constant 0 : index
    %24 = vector.load %arg4[%c0_11, %c0_12] : memref<1x128xf32, #tpu.memory_space<vmem>>, vector<1x128xf32>
    %25 = vector.broadcast %24 : vector<1x128xf32> to vector<8x128xf32>
    %26 = arith.mulf %23, %25 : vector<8x128xf32>
    %c0_13 = arith.constant 0 : index
    %c0_14 = arith.constant 0 : index
    %27 = vector.load %arg5[%c0_13, %c0_14] : memref<1x128xf32, #tpu.memory_space<vmem>>, vector<1x128xf32>
    %28 = vector.broadcast %27 : vector<1x128xf32> to vector<8x128xf32>
    %29 = arith.addf %26, %28 : vector<8x128xf32>
    %c0_15 = arith.constant 0 : index
    %c0_16 = arith.constant 0 : index
    %30 = vector.load %arg6[%c0_15, %c0_16] : memref<8x128xf32, #tpu.memory_space<vmem>>, vector<8x128xf32>
    tpu.vector_store %arg6[%c0_15, %c0_16], %29 {strides = array<i32>} : memref<8x128xf32, #tpu.memory_space<vmem>>, vector<8x128xf32>,
    return
  }
  func.func @transform_0(%arg0: i32) -> (i32, i32) {
    %c0_i32 = arith.constant 0 : i32
    %c0_i32_0 = arith.constant 0 : i32
    %c0_i32_1 = arith.constant 0 : i32
    return %c0_i32, %c0_i32_0 : i32, i32
  }
  func.func @transform_1(%arg0: i32) -> (i32, i32) {
    %c0_i32 = arith.constant 0 : i32
    %c0_i32_0 = arith.constant 0 : i32
    return %c0_i32, %arg0 : i32, i32
  }
  func.func @transform_2(%arg0: i32) -> (i32, i32) {
    %c0_i32 = arith.constant 0 : i32
    %c0_i32_0 = arith.constant 0 : i32
    return %c0_i32, %arg0 : i32, i32
  }
  func.func @transform_3(%arg0: i32) -> (i32, i32) {
    %c0_i32 = arith.constant 0 : i32
    %c0_i32_0 = arith.constant 0 : i32
    return %c0_i32, %arg0 : i32, i32
  }
  func.func @transform_4(%arg0: i32) -> (i32, i32) {
    %c0_i32 = arith.constant 0 : i32
    %c0_i32_0 = arith.constant 0 : i32
    return %c0_i32, %arg0 : i32, i32
  }
  func.func @transform_5(%arg0: i32) -> (i32, i32) {
    %c0_i32 = arith.constant 0 : i32
    %c0_i32_0 = arith.constant 0 : i32
    return %c0_i32, %arg0 : i32, i32
  }
}

</mosaic_0001>

<bundles_post_ra>
// kernel: tpu_custom_call.1
= control target key start
LH: loop header
LB: loop body
LE: loop exit
PB: predicated region body
PF: predicated region fallthrough
CT: control target
= control target key end

     0   :  { %10 = vsyncpa [#allocation3], 0  ;;  %s336_s0 = inlined_call_operand.hbm [shape: f32[8,32], index: 0, kind: input, shape index: {}]   ;;  %s337_s1 = inlined_call_operand.hbm [shape: f32[32,128], index: 1, kind: input, shape index: {}]   ;;  %s338_s2 = inlined_call_operand.vmem [shape: f32[1,128], index: 2, kind: input, shape index: {}]   ;;  %s339_s3 = inlined_call_operand.vmem [shape: f32[1,128], index: 3, kind: input, shape index: {}]   ;;  %s340_s4 = inlined_call_operand.vmem [shape: f32[1,128], index: 4, kind: input, shape index: {}]   ;;  %s341_s5 = inlined_call_operand.hbm [shape: f32[8,128], index: 5, kind: output, shape index: {}]  }
   0x1   :  { %11 = vsyncpa [#allocation6], 0 }
   0x2   :  { %12 = vsyncpa [#allocation4], 0  ;;  %s281_s18 = smov [#allocation2]   ;;  %s282_s20 = smov [#allocation5]  }
   0x3   :  { %s19_s19 = sshll.u32 %s281_s18, 4  ;;  %s28_s21 = sshll.u32 %s282_s20, 4  ;;  %s20_s19 = int_to_ptr.vmem [resolvable:$true] %s19_s19  ;;  %s29_s21 = int_to_ptr.vmem [resolvable:$true] %s28_s21 }
   0x4   :  { %s223_s22 = scalar_lea.vmem %s20_s19, 128  ;;  %p228_p1 = scmp.lt.s32.totalorder %s20_s19, %s20_s19 }
   0x5   :  { %p224_p0 = scmp.ne.s32.totalorder %s20_s19, %s223_s22  ;;  %p229_p2 = scmp.lt.s32.totalorder %s223_s22, %s223_s22 }
   0x7   :  { %p230_p3 = por %p229_p2, %p228_p1 }
   0x9   :  { %p231_p4 = pnand %p230_p3, %p224_p0 }
   0xb   :  { %234 = shalt.err (!%p231_p4)
}
   0xc   :  { %22 = dma.hbm_to_vmem [thread:$0]  %s336_s0, 128, %s20_s19, [#allocation3]  }
   0xd   :  { %s243_s25 = scalar_lea.vmem %s29_s21, 512  ;;  %p248_p6 = scmp.lt.s32.totalorder %s29_s21, %s29_s21 }
   0xe   :  { %p244_p5 = scmp.ne.s32.totalorder %s29_s21, %s243_s25  ;;  %p249_p7 = scmp.lt.s32.totalorder %s243_s25, %s243_s25 }
  0x10   :  { %p250_p8 = por %p249_p7, %p248_p6 }
  0x12   :  { %p251_p9 = pnand %p250_p8, %p244_p5 }
  0x14   :  { %254 = shalt.err (!%p251_p9)
}
  0x15   :  { %s283_s26 = smov 128   ;;  %s284_s27 = smov 8  }
  0x16   :  { %34 = dma.hbm_to_vmem [thread:$0]  %s337_s1, 512, %s29_s21, [#allocation6], %s283_s26, %s283_s26, %s284_s27  }
  0x17   :  { %275 = dma.done.wait [#allocation3], 128  }
  0x18   :  { %276 = vsyncadd [#allocation3], 4294967168 }
  0x19   :  { %277 = dma.done.wait [#allocation6], 512  }
  0x1a   :  { %278 = vsyncadd [#allocation6], 4294966784  ;;  %v285_v0 = vmov 0.0   ;;  %vm286_vm0 = vmmov 0   ;;  %v51_v1 = vld [vmem:[#allocation5 + $0x18] sm:$0xff]  ;;  %v50_v2 = vld [vmem:[#allocation5 + $0x10] sm:$0xff] }
  0x1b   :  { %195 = vmatprep.subr.mxu0 %v285_v0  ;;  %203 = vmatprep.mubr.msk.f32.mxu0 %vm286_vm0, %v285_v0  ;;  %v49_v3 = vld [vmem:[#allocation5 + $0x8] sm:$0xff]  ;;  %v48_v4 = vld [vmem:[#allocation5] sm:$0xff]  ;;  %v47_v5 = vld [vmem:[#allocation2] sm:$0xff]  ;;  %vm59_vm1 = vcmask 261120   ;;  %s287_s8 = smov [#allocation7]  }
  0x1c   :  { %196 = vmatpush3.msra.mxu0 %v51_v1  ;;  %v186_v6 = vld [vmem:[%s338_s2] ss:$0 sm:$0xff]  ;;  %s176_s9 = sshll.u32 %s287_s8, 4  ;;  %s177_s9 = int_to_ptr.vmem [resolvable:$true] %s176_s9 }
  0x1d   :  { %197 = vmatprep.subr.mxu0 %v285_v0  ;;  %v188_v29 = vld [vmem:[%s339_s3] ss:$0 sm:$0xff]  ;;  %s255_s10 = scalar_lea.vmem %s177_s9, 128  ;;  %p260_p11 = scmp.lt.s32.totalorder %s177_s9, %s177_s9 }
  0x1e   :  { %198 = vmatpush3.msra.mxu0 %v50_v2  ;;  %v189_v31 = vld [vmem:[%s340_s4] ss:$0 sm:$0xff]  ;;  %p256_p10 = scmp.ne.s32.totalorder %s177_s9, %s255_s10  ;;  %p261_p12 = scmp.lt.s32.totalorder %s255_s10, %s255_s10 }
  0x1f   :  { %199 = vmatprep.subr.mxu0 %v285_v0 }
  0x20   :  { %200 = vmatpush3.msra.mxu0 %v49_v3  ;;  %p262_p13 = por %p261_p12, %p260_p11 }
  0x21   :  { %201 = vmatprep.subr.mxu0 %v285_v0 }
  0x22   :  { %202 = vmatpush3.msra.mxu0 %v48_v4  ;;  %p263_p0 = pnand %p262_p13, %p256_p10 }
  0x23   :  { %204 = vmatmul.mubr.msk.f32.vlgmr.msra.gmra.mxu0 %vm59_vm1, %v47_v5 }
  0xe3   :  { %v129_v7 = vpop.f32.mrf.mxu0 }
  0xe4   :  { %v130_v8 = vadd.f32 %v186_v6, %v129_v7 }
  0xe5   :  { %v205_v9 = vpop.f32.mrf.mxu0 }
  0xe6   :  { %v133_v10 = vmax.f32 %v130_v8, 0.0 }
  0xe8   :  { %v134_v11 = vrot.slane %v133_v10, 4 }
  0xea   :  { %v135_v12 = vadd.f32 %v134_v11, %v133_v10 }
  0xec   :  { %v136_v13 = vrot.slane %v135_v12, 2 }
  0xee   :  { %v137_v14 = vadd.f32 %v136_v13, %v135_v12 }
  0xf0   :  { %v138_v15 = vrot.slane %v137_v14, 1 }
  0xf2   :  { %v139_v16 = vadd.f32 %v138_v15, %v137_v14 }
  0xf4   :  { %v140_v17 = vmul.f32 0.125, %v139_v16 }
  0xf6   :  { %v141_v18 = vsub.f32 %v133_v10, %v140_v17 }
  0xf8   :  { %v142_v19 = vmul.f32 %v141_v18, %v141_v18 }
  0xfa   :  { %v143_v20 = vrot.slane %v142_v19, 4 }
  0xfc   :  { %v144_v21 = vadd.f32 %v143_v20, %v142_v19 }
  0xfe   :  { %v145_v22 = vrot.slane %v144_v21, 2 }
 0x100   :  { %v146_v23 = vadd.f32 %v145_v22, %v144_v21 }
 0x102   :  { %v147_v24 = vrot.slane %v146_v23, 1 }
 0x104   :  { %v148_v25 = vadd.f32 %v147_v24, %v146_v23 }
 0x106   :  { %v149_v26 = vmul.f32 0.125, %v148_v25 }
 0x108   :  { %v150_v27 = vadd.f32 1e-05, %v149_v26 }
 0x10a   :  { %213 = vrsqrt.f32 %v150_v27 }
 0x117   :  { %v214_v28 = vpop.eup %213 }
 0x118   :  { %v152_v30 = vmul.f32 %v214_v28, %v141_v18 }
 0x11a   :  { %v160_v32 = vmul.f32 %v188_v29, %v152_v30 }
 0x11c   :  { %v168_v33 = vadd.f32 %v189_v31, %v160_v32 }
 0x11e   :  { %169 = vst [vmem:[#allocation7] sm:$0xff] %v168_v33 }
 0x11f   :  { %266 = shalt.err (!%p263_p0)
}
 0x120   :  { %179 = dma.vmem_to_hbm [thread:$0]  %s177_s9, 128, %s341_s5, [#allocation4]  }
 0x121   :  { %279 = dma.done.wait [#allocation4], 128  }
 0x122   :  { %280 = vsyncadd [#allocation4], 4294967168 }
 0x123   :  { %183 = vsyncpa [#allocation3], 1 }
 0x124   :  { %184 = vsyncpa [#allocation6], 1 }
 0x125   :  { %185 = vsyncpa [#allocation4], 1 }

</bundles_post_ra>
